<compile_context>
chip_gen: v7x
topology: tpu7x:2x2x1
jax: 0.10.0
libtpu: 0.0.40
codegen_flags: <defaults>
</compile_context>

<pallas_src>
import jax
import jax.numpy as jnp
from jax.experimental import pallas as pl
from jax.experimental.pallas import tpu as pltpu


LANE = 128     # vreg lane width
SUBLANE = 8    # f32 sublane height


def _round_up(n, m):
    return (n + m - 1) // m * m


def _vmem_budget():
    """(capacity, usable budget) in bytes; conservative default if unknown."""
    try:
        cap = int(pltpu.get_tpu_info().vmem_capacity_bytes)
    except Exception:
        cap = 64 << 20  # v7x per-TC VMEM: the smallest generation
    return cap, int(0.8 * cap)


def _resident_kernel(x_ref, w_ref, b_ref, o_ref):
    # Fused: bf16 MXU matmul (f32 accumulate) + f32 bias add + f32 residual.
    x = x_ref[...]
    y = jnp.dot(x.astype(jnp.bfloat16), w_ref[...].astype(jnp.bfloat16),
                preferred_element_type=jnp.float32)
    o_ref[...] = (y + b_ref[...].astype(jnp.float32)
                  + x.astype(jnp.float32)).astype(o_ref.dtype)


def _ntiled_kernel(x_ref, xres_ref, w_ref, b_ref, o_ref):
    # x_ref:   (tm, H)  full row block, resident across the inner N axis
    # xres_ref:(tm, tn) residual slice (same columns as this output tile)
    # w_ref:   (H, tn)  bf16 weight column tile
    y = jnp.dot(x_ref[...].astype(jnp.bfloat16), w_ref[...].astype(jnp.bfloat16),
                preferred_element_type=jnp.float32)
    o_ref[...] = (y + b_ref[...].astype(jnp.float32)
                  + xres_ref[...].astype(jnp.float32)).astype(o_ref.dtype)


def residual_linear(x, w, b, *, tile_m=None, tile_n=512, force_n_tiled=False):
    """out = x @ w + b + x.   x: [M, H]; w: [H, H] ([in, out]); b: [1, H]."""
    M, H = x.shape
    assert w.shape == (H, H) and b.shape == (1, H)

    act_item = jnp.dtype(x.dtype).itemsize
    w_bf16 = w.astype(jnp.bfloat16)  # one-time cast; MXU-native, half the VMEM

    cap, budget = _vmem_budget()
    single_buf_ok = hasattr(pl, "Buffered")

    # ---- M tile: big on 128-MiB parts (v5e/v6e), ~512 on v7x (64 MiB/TC) ----
    if tile_m is None:
        tile_m = 1024 if cap >= (96 << 20) else 512
    tm = max(SUBLANE, min(_round_up(tile_m, SUBLANE), _round_up(M, SUBLANE)))
    # Keep >= 2 M tiles so the 'parallel' axis has work for both v7x cores.
    if pl.cdiv(M, tm) < 2 and M > SUBLANE:
        tm = _round_up(pl.cdiv(M, 2), SUBLANE)

    w_bufs = 1 if single_buf_ok else 2
    resident_bytes = w_bufs * (H * H * w_bf16.dtype.itemsize + H * b.dtype.itemsize)

    def act_bytes(tm_):
        # double-buffered x tile + double-buffered out tile
        return 4 * tm_ * H * act_item

    can_n_tile = (H % LANE == 0)
    if force_n_tiled and can_n_tile:
        use_resident = False
    elif not can_n_tile:
        # TODO(synk): N-tiled fallback requires H % 128 == 0; keep W resident.
        use_resident = True
    else:
        use_resident = resident_bytes + act_bytes(tm) <= budget

    if use_resident:
        # Shrink tm (never below a sublane) until the working set fits.
        while tm > SUBLANE and resident_bytes + act_bytes(tm) > budget:
            tm = _round_up(max(tm // 2, SUBLANE), SUBLANE)
        grid_m = pl.cdiv(M, tm)
        need = resident_bytes + act_bytes(tm)
        vmem_limit = int(min(max(int(1.25 * need), 16 << 20), budget))

        def call(single_buffer):
            res_kw = dict(pipeline_mode=pl.Buffered(1)) if single_buffer else {}
            return pl.pallas_call(
                _resident_kernel,
                out_shape=jax.ShapeDtypeStruct((M, H), x.dtype),
                grid_spec=pl.GridSpec(
                    grid=(grid_m,),
                    in_specs=[
                        pl.BlockSpec((tm, H), lambda i: (i, 0)),          # x streamed over M
                        pl.BlockSpec((H, H), lambda i: (0, 0), **res_kw),  # W resident (bf16)
                        pl.BlockSpec((1, H), lambda i: (0, 0), **res_kw),  # bias resident
                    ],
                    out_specs=pl.BlockSpec((tm, H), lambda i: (i, 0)),
                ),
                compiler_params=pltpu.CompilerParams(
                    dimension_semantics=("parallel",),
                    vmem_limit_bytes=vmem_limit,
                ),
            )(x, w_bf16, b)

        if single_buf_ok:
            try:
                return call(True)
            except Exception:
                pass  # older/limited Pallas: fall back to default double buffers
        return call(False)

    # ---- N-tiled fallback: resident W doesn't fit (e.g. large H on v7x) ----
    tn = max(LANE, (min(tile_n, H) // LANE) * LANE)
    while H % tn != 0:          # H % 128 == 0 guaranteed here -> terminates
        tn -= LANE
    grid_n = H // tn

    def n_act_bytes(tm_):
        return (2 * tm_ * H * act_item                      # x row block
                + 2 * tm_ * tn * act_item                   # x residual block
                + 2 * tm_ * tn * act_item                   # out block
                + 2 * H * tn * w_bf16.dtype.itemsize        # W column tile
                + 2 * tn * b.dtype.itemsize)                # bias tile

    while tm > SUBLANE and n_act_bytes(tm) > budget:
        tm = _round_up(max(tm // 2, SUBLANE), SUBLANE)
    grid_m = pl.cdiv(M, tm)
    need = n_act_bytes(tm)
    vmem_limit = int(min(max(int(1.25 * need), 16 << 20), budget))

    return pl.pallas_call(
        _ntiled_kernel,
        out_shape=jax.ShapeDtypeStruct((M, H), x.dtype),
        grid_spec=pl.GridSpec(
            grid=(grid_m, grid_n),
            in_specs=[
                pl.BlockSpec((tm, H), lambda i, j: (i, 0)),    # x rows, resident over j
                pl.BlockSpec((tm, tn), lambda i, j: (i, j)),   # x residual slice
                pl.BlockSpec((H, tn), lambda i, j: (0, j)),    # W column tile (bf16)
                pl.BlockSpec((1, tn), lambda i, j: (0, j)),    # bias tile
            ],
            out_specs=pl.BlockSpec((tm, tn), lambda i, j: (i, j)),
        ),
        compiler_params=pltpu.CompilerParams(
            dimension_semantics=("parallel", "arbitrary"),
            vmem_limit_bytes=vmem_limit,
        ),
    )(x, x, w_bf16, b)


if __name__ == "__main__":
    # --- Test 1: resident-W fast path (module-sized small shapes) ---
    batch, seq, hidden = 2, 8, 32
    key = jax.random.PRNGKey(0)
    kx, kw, kb = jax.random.split(key, 3)

    x = jax.random.normal(kx, (batch, seq, hidden), dtype=jnp.float32)
    w_pt = jax.random.normal(kw, (hidden, hidden), dtype=jnp.float32) * 0.02  # (out, in)
    b_pt = jax.random.normal(kb, (hidden,), dtype=jnp.float32) * 0.02         # (out,)

    x2d = x.reshape(batch * seq, hidden)
    out = residual_linear(x2d, w_pt.T, b_pt.reshape(1, hidden))
    out = out.reshape(batch, seq, hidden)
    jax.block_until_ready(out)

    ref = x @ w_pt.T + b_pt + x   # Residual.forward: fn(x) + x
    # bf16 matmul products -> looser tolerance than pure-f32.
    assert jnp.allclose(out, ref, atol=1e-2, rtol=1e-2), "resident-path mismatch"

    # --- Test 2: exercise the N-tiled fallback (used for large H on v7x) ---
    m2, hidden2 = 48, 256
    k2x, k2w, k2b = jax.random.split(jax.random.PRNGKey(1), 3)
    x2 = jax.random.normal(k2x, (m2, hidden2), dtype=jnp.float32)
    w2 = jax.random.normal(k2w, (hidden2, hidden2), dtype=jnp.float32) * 0.02
    b2 = jax.random.normal(k2b, (hidden2,), dtype=jnp.float32) * 0.02

    out2 = residual_linear(x2, w2.T, b2.reshape(1, hidden2),
                           tile_n=128, force_n_tiled=True)
    jax.block_until_ready(out2)
    ref2 = x2 @ w2.T + b2 + x2
    assert jnp.allclose(out2, ref2, atol=1e-2, rtol=1e-2), "n-tiled-path mismatch"

    print("KERNEL_OK")
</pallas_src>

<mosaic_0001>
module attributes {stable_mosaic.version = 11 : i64} {
  func.func @_resident_kernel(%arg0: i32, %arg1: memref<8x32xf32, #tpu.memory_space<vmem>>, %arg2: memref<32x32xbf16, #tpu.memory_space<vmem>>, %arg3: memref<1x32xf32, #tpu.memory_space<vmem>>, %arg4: memref<8x32xf32, #tpu.memory_space<vmem>>) attributes {dimension_semantics = [#tpu.dimension_semantics<parallel>], iteration_bounds = array<i64: 2>, scalar_prefetch = 0 : i64, scratch_operands = 0 : i64, tpu.core_type = #tpu.core_type<tc>, window_params = [{transform_indices = @transform_0, window_bounds = array<i64: 8, 32>}, {pipeline_mode = #tpu.pipeline_mode<synchronous>, transform_indices = @transform_1, window_bounds = array<i64: 32, 32>}, {pipeline_mode = #tpu.pipeline_mode<synchronous>, transform_indices = @transform_2, window_bounds = array<i64: 1, 32>}, {transform_indices = @transform_3, window_bounds = array<i64: 8, 32>}]} {
    %c0 = arith.constant 0 : index
    %c0_0 = arith.constant 0 : index
    %0 = vector.load %arg1[%c0, %c0_0] : memref<8x32xf32, #tpu.memory_space<vmem>>, vector<8x32xf32>
    %1 = arith.truncf %0 : vector<8x32xf32> to vector<8x32xbf16>
    %c0_1 = arith.constant 0 : index
    %c0_2 = arith.constant 0 : index
    %2 = vector.load %arg2[%c0_1, %c0_2] : memref<32x32xbf16, #tpu.memory_space<vmem>>, vector<32x32xbf16>
    %cst = arith.constant dense<0.000000e+00> : vector<8x32xf32>
    %3 = tpu.matmul %1, %2, %cst {dimension_numbers = #tpu.dot_dimension_numbers<[1], [0], [0], [1], [0, 0, 1, 1], [], []>} : vector<8x32xbf16>, vector<32x32xbf16>, vector<8x32xf32> -> vector<8x32xf32>
    %c0_3 = arith.constant 0 : index
    %c0_4 = arith.constant 0 : index
    %4 = vector.load %arg3[%c0_3, %c0_4] : memref<1x32xf32, #tpu.memory_space<vmem>>, vector<1x32xf32>
    %5 = vector.broadcast %4 : vector<1x32xf32> to vector<8x32xf32>
    %6 = arith.addf %3, %5 : vector<8x32xf32>
    %7 = arith.addf %6, %0 : vector<8x32xf32>
    %c0_5 = arith.constant 0 : index
    %c0_6 = arith.constant 0 : index
    %8 = vector.load %arg4[%c0_5, %c0_6] : memref<8x32xf32, #tpu.memory_space<vmem>>, vector<8x32xf32>
    tpu.vector_store %arg4[%c0_5, %c0_6], %7 {strides = array<i32>} : memref<8x32xf32, #tpu.memory_space<vmem>>, vector<8x32xf32>,
    return
  }
  func.func @transform_0(%arg0: i32) -> (i32, i32) {
    %c0_i32 = arith.constant 0 : i32
    %c0_i32_0 = arith.constant 0 : i32
    return %arg0, %c0_i32 : i32, i32
  }
  func.func @transform_1(%arg0: i32) -> (i32, i32) {
    %c0_i32 = arith.constant 0 : i32
    %c0_i32_0 = arith.constant 0 : i32
    %c0_i32_1 = arith.constant 0 : i32
    return %c0_i32, %c0_i32_0 : i32, i32
  }
  func.func @transform_2(%arg0: i32) -> (i32, i32) {
    %c0_i32 = arith.constant 0 : i32
    %c0_i32_0 = arith.constant 0 : i32
    %c0_i32_1 = arith.constant 0 : i32
    return %c0_i32, %c0_i32_0 : i32, i32
  }
  func.func @transform_3(%arg0: i32) -> (i32, i32) {
    %c0_i32 = arith.constant 0 : i32
    %c0_i32_0 = arith.constant 0 : i32
    return %arg0, %c0_i32 : i32, i32
  }
}

module attributes {stable_mosaic.version = 11 : i64} {
  func.func @_resident_kernel(%arg0: i32, %arg1: memref<8x32xf32, #tpu.memory_space<vmem>>, %arg2: memref<32x32xbf16, #tpu.memory_space<vmem>>, %arg3: memref<1x32xf32, #tpu.memory_space<vmem>>, %arg4: memref<8x32xf32, #tpu.memory_space<vmem>>) attributes {dimension_semantics = [#tpu.dimension_semantics<parallel>], iteration_bounds = array<i64: 2>, scalar_prefetch = 0 : i64, scratch_operands = 0 : i64, tpu.core_type = #tpu.core_type<tc>, window_params = [{transform_indices = @transform_0, window_bounds = array<i64: 8, 32>}, {pipeline_mode = #tpu.pipeline_mode<synchronous>, transform_indices = @transform_1, window_bounds = array<i64: 32, 32>}, {pipeline_mode = #tpu.pipeline_mode<synchronous>, transform_indices = @transform_2, window_bounds = array<i64: 1, 32>}, {transform_indices = @transform_3, window_bounds = array<i64: 8, 32>}]} {
    %c0 = arith.constant 0 : index
    %c0_0 = arith.constant 0 : index
    %0 = vector.load %arg1[%c0, %c0_0] : memref<8x32xf32, #tpu.memory_space<vmem>>, vector<8x32xf32>
    %1 = arith.truncf %0 : vector<8x32xf32> to vector<8x32xbf16>
    %c0_1 = arith.constant 0 : index
    %c0_2 = arith.constant 0 : index
    %2 = vector.load %arg2[%c0_1, %c0_2] : memref<32x32xbf16, #tpu.memory_space<vmem>>, vector<32x32xbf16>
    %cst = arith.constant dense<0.000000e+00> : vector<8x32xf32>
    %3 = tpu.matmul %1, %2, %cst {dimension_numbers = #tpu.dot_dimension_numbers<[1], [0], [0], [1], [0, 0, 1, 1], [], []>} : vector<8x32xbf16>, vector<32x32xbf16>, vector<8x32xf32> -> vector<8x32xf32>
    %c0_3 = arith.constant 0 : index
    %c0_4 = arith.constant 0 : index
    %4 = vector.load %arg3[%c0_3, %c0_4] : memref<1x32xf32, #tpu.memory_space<vmem>>, vector<1x32xf32>
    %5 = vector.broadcast %4 : vector<1x32xf32> to vector<8x32xf32>
    %6 = arith.addf %3, %5 : vector<8x32xf32>
    %7 = arith.addf %6, %0 : vector<8x32xf32>
    %c0_5 = arith.constant 0 : index
    %c0_6 = arith.constant 0 : index
    %8 = vector.load %arg4[%c0_5, %c0_6] : memref<8x32xf32, #tpu.memory_space<vmem>>, vector<8x32xf32>
    tpu.vector_store %arg4[%c0_5, %c0_6], %7 {strides = array<i32>} : memref<8x32xf32, #tpu.memory_space<vmem>>, vector<8x32xf32>,
    return
  }
  func.func @transform_0(%arg0: i32) -> (i32, i32) {
    %c0_i32 = arith.constant 0 : i32
    %c0_i32_0 = arith.constant 0 : i32
    return %arg0, %c0_i32 : i32, i32
  }
  func.func @transform_1(%arg0: i32) -> (i32, i32) {
    %c0_i32 = arith.constant 0 : i32
    %c0_i32_0 = arith.constant 0 : i32
    %c0_i32_1 = arith.constant 0 : i32
    return %c0_i32, %c0_i32_0 : i32, i32
  }
  func.func @transform_2(%arg0: i32) -> (i32, i32) {
    %c0_i32 = arith.constant 0 : i32
    %c0_i32_0 = arith.constant 0 : i32
    %c0_i32_1 = arith.constant 0 : i32
    return %c0_i32, %c0_i32_0 : i32, i32
  }
  func.func @transform_3(%arg0: i32) -> (i32, i32) {
    %c0_i32 = arith.constant 0 : i32
    %c0_i32_0 = arith.constant 0 : i32
    return %arg0, %c0_i32 : i32, i32
  }
}

</mosaic_0001>

<bundles_post_ra>
// kernel: tpu_custom_call.1
= control target key start
LH: loop header
LB: loop body
LE: loop exit
PB: predicated region body
PF: predicated region fallthrough
CT: control target
= control target key end

     0   :  { %8 = vsyncpa [#allocation3], 0  ;;  %s815_s0 = inlined_call_operand.hbm [shape: f32[16,32], index: 0, kind: input, shape index: {}]   ;;  %s816_s1 = inlined_call_operand.hbm [shape: bf16[32,32], index: 1, kind: input, shape index: {}]   ;;  %s817_s2 = inlined_call_operand.vmem [shape: f32[1,32], index: 2, kind: input, shape index: {}]   ;;  %s818_s3 = inlined_call_operand.hbm [shape: f32[16,32], index: 3, kind: output, shape index: {}]  }
   0x1   :  { %10 = vsyncpa [#allocation3 + $0x1], 0 }
   0x2   :  { %11 = vsyncpa [#allocation6], 0 }
   0x3   :  { %12 = vsyncpa [#allocation4], 0 }
   0x4   :  { %14 = vsyncpa [#allocation4 + $0x1], 0  ;;  %s616_s12 = smov 0   ;;  %s618_s13 = smov 0  }
   0x5   :  { %s620_s14 = smov 0   ;;  %s622_s15 = smov 0  }
   0x6 LB: > { %s637_s16 = sadd.s32 4294967295, %s587_s15   ;;  %s367_s17 = sadd.s32 4294967294, %s587_s15   ;;  %s587_s15 = sphi %s622_s15, %s838_s15   ;;  %s583_s14 = sphi %s620_s14, %s837_s14   ;;  %s579_s13 = sphi %s618_s13, %s836_s13   ;;  %s575_s12 = sphi %s616_s12, %s835_s12  }
   0x7   : > { %p40_p0 = scmp.ne.s32.totalorder %s579_s13, %s575_s12  ;;  %p819_p1 = scmp.eq.s32.totalorder %s637_s16, 0 }
   0x8   : > { %p112_p3 = scmp.eq.s32.totalorder %s367_s17, 1  ;;  %p368_p5 = scmp.ge.s32.totalorder %s587_s15, 1 }
   0x9   : > { %p646_p4 = por %p819_p1, %p40_p0  ;;  %p119_p7 = scmp.lt.s32.totalorder %s587_s15, 3 }
   0xa   : > { %p651_p6 = por %p112_p3, %p40_p0  ;;  %s589_s21 = smov [#allocation5]  }
   0xb   : > { %s822_s18 = scalar_select %p646_p4, 1, 0 }
   0xc   : > { %s823_s19 = scalar_select %p651_p6, 1, 0 }
   0xd   : > { %p656_p8 = pnand %p368_p5, %p119_p7  ;;  %s131_s22 = sshll.u32 %s589_s21, 4  ;;  %s660_s22 = int_to_ptr.vmem [resolvable:$true] %s131_s22 }
   0xe   : > { %s672_s24 = sadd.s32 1, %s587_s15   ;;  %s27_s25 = sadd.s32 1, %s583_s14 }
   0xf   : > { %s824_s20 = scalar_select %p656_p8, 1, 0 }
  0x10   : > { %p404_p9 = pneg %p656_p8  ;;  %s24_s26 = ssub.s32 %s587_s15, %s672_s24 }
  0x11   : > { %s459_s29 = scalar_lea.hbm %s816_s1, 256 }
  0x12   : > { %p667_p11 = pnand %p404_p9, %p819_p1  ;;  %p460_p12 = scmp.ne.s32.totalorder %s816_s1, %s459_s29 }
  0x13   : > { %p466_p5 = scmp.lt.u32.totalorder %s459_s29, %s816_s1 }
  0x14   : > { %p461_p13 = pneg %p667_p11 }
  0x16   : > { %p462_p0 = pnand %p461_p13, %p460_p12 }
  0x18   : > { %p463_p3 = pneg %p462_p0 }
  0x1a   : > { %p468_p7 = pnand %p466_p5, %p463_p3 }
  0x1c   : > { %471 = shalt.err (!%p468_p7)
}
  0x1d   : > { %s472_s7 = scalar_lea.vmem %s660_s22, 256  ;;  %p480_p2 = scmp.lt.s32.totalorder %s660_s22, %s660_s22 }
  0x1e   : > { %p473_p9 = scmp.ne.s32.totalorder %s660_s22, %s472_s7  ;;  %p481_p6 = scmp.lt.s32.totalorder %s472_s7, %s472_s7 }
  0x20   : > { %p475_p10 = pnand %p473_p9, %p461_p13  ;;  %p482_p4 = por %p481_p6, %p480_p2 }
  0x22   : > { %p476_p1 = pneg %p475_p10 }
  0x24   : > { %p483_p8 = pnand %p482_p4, %p476_p1 }
  0x26   : > { %486 = shalt.err (!%p483_p8)
}
  0x27   : > { %s590_s8 = smov 64   ;;  %s591_s9 = smov 4  }
  0x28   : > { %407 = dma.hbm_to_vmem [thread:$0]  (!%p667_p11), %s816_s1, 256, %s660_s22, [#allocation6], %s590_s8, %s590_s8, %s591_s9  }
  0x29   : > { %p25_p2 = scmp.eq.s32.totalorder %s24_s26, 0  ;;  %p34_p1 = scmp.ne.s32.totalorder %s583_s14, %s579_s13 }
  0x2a   : > { %p35_p4 = scmp.eq.s32.totalorder %s587_s15, 0  ;;  %p417_p6 = scmp.lt.s32.totalorder %s587_s15, 2 }
  0x2b   : > { %s703_s17 = scalar_select %p25_p2, %s583_s14, %s27_s25  }
  0x2c   : > { %p36_p8 = por %p35_p4, %p34_p1  ;;  %p826_p10 = scmp.eq.s32.totalorder %s637_s16, 1 }
  0x2d   : > { %s148_s27 = sand.u32 1, %s583_s14   ;;  %s372_s28 = sshll.u32 %s587_s15, 7 }
  0x2e   : > { %p707_p12 = por %p826_p10, %p34_p1  ;;  %s371_s29 = sshll.u32 %s148_s27, 3 }
  0x2f   : > { %s716_s4 = scalar_lea.hbm %s815_s0, %s372_s28  ;;  %s152_s22 = scalar_lea.vmem [#allocation2], %s371_s29 }
  0x30   : > { %s159_s25 = sshll.u32 %s152_s22, 4  ;;  %p718_p11 = pnand %p417_p6, %p36_p8  ;;  %s722_s25 = int_to_ptr.vmem [resolvable:$true] %s159_s25 }
  0x31   : > { %s149_s5 = scalar_lea.sflag [#allocation3], %s148_s27  ;;  %s487_s6 = scalar_lea.hbm %s716_s4, 128 }
  0x32   : > { %p488_p13 = scmp.ne.s32.totalorder %s716_s4, %s487_s6  ;;  %p489_p0 = pneg %p718_p11 }
  0x33   : > { %s492_s9 = scalar_lea.hbm %s815_s0, 256  ;;  %p493_p7 = scmp.lt.u32.totalorder %s716_s4, %s815_s0 }
  0x34   : > { %p490_p3 = pnand %p489_p0, %p488_p13  ;;  %p494_p9 = scmp.lt.u32.totalorder %s492_s9, %s487_s6 }
  0x35   : > { %p496_p1 = scmp.lt.u32.totalorder %s487_s6, %s716_s4 }
  0x36   : > { %p491_p5 = pneg %p490_p3  ;;  %p495_p2 = por %p494_p9, %p493_p7 }
  0x38   : > { %p497_p4 = por %p496_p1, %p495_p2 }
  0x3a   : > { %p498_p6 = pnand %p497_p4, %p491_p5 }
  0x3c   : > { %501 = shalt.err (!%p498_p6)
}
  0x3d   : > { %s502_s27 = scalar_lea.vmem %s722_s25, 128  ;;  %s592_s28 = smov [#allocation2]  }
  0x3e   : > { %p503_p8 = scmp.ne.s32.totalorder %s722_s25, %s502_s27  ;;  %s507_s29 = sshll.u32 %s592_s28, 4  ;;  %s508_s29 = int_to_ptr.vmem [resolvable:$false] %s507_s29 }
  0x3f   : > { %s509_s23 = scalar_lea.vmem %s508_s29, 256  ;;  %p510_p3 = scmp.lt.s32.totalorder %s722_s25, %s508_s29 }
  0x40   : > { %p505_p10 = pnand %p503_p8, %p489_p0  ;;  %p511_p7 = scmp.lt.s32.totalorder %s509_s23, %s502_s27 }
  0x42   : > { %p506_p13 = pneg %p505_p10  ;;  %p512_p9 = por %p511_p7, %p510_p3 }
  0x44   : > { %p513_p2 = pnand %p512_p9, %p506_p13 }
  0x46   : > { %516 = shalt.err (!%p513_p2)
}
  0x47   : > { %411 = dma.hbm_to_vmem [thread:$0]  (!%p718_p11), %s716_s4, 128, %s722_s25, %s149_s5  }
  0x48   : > { %p829_p5 = scmp.ne.s32.totalorder %s824_s20, 0 }
  0x49   : > { %s752_s30 = sand.u32 (!%p829_p5), 1, %s579_s13   ;;  %p830_p0 = scmp.ne.s32.totalorder (!%p829_p5), %s822_s18, 0 }
  0x4a   : > { %168 = sbr.rel (%p829_p5) target bundleno = 324 (0x144), region = 32  ;;  %s374_s22 = sshll.u32 (!%p829_p5), %s752_s30, 3 }
  0x4b   : > { %s171_s6 = scalar_lea.sflag (!%p829_p5), [#allocation3], %s752_s30  ;;  %s174_s7 = scalar_lea.vmem (!%p829_p5), [#allocation2], %s374_s22 }
  0x51   : > { %562 = dma.done.wait (%p830_p0), %s171_s6, 128  }
  0x52   : > { %564 = vsyncadd (%p830_p0), %s171_s6, 4294967168  ;;  %p831_p1 = scmp.eq.s32.totalorder %s637_s16, 0 }
  0x54   : > { %566 = dma.done.wait (%p831_p1), [#allocation6], 256   ;;  %p832_p11 = pmov %p831_p1 }
  0x55   : > { %v593_v0 = vmov 0.0   ;;  %vm594_vm0 = vmmov 0   ;;  %v457_v1 = vld [vmem:[#allocation5] sm:$0xff]   ;;  %v458_v2 = vld [vmem:[#allocation5 + $0x8] sm:$0xff]   ;;  %v202_v3 = vld [vmem:[%s174_s7] sm:$0xff]  ;;  %vm227_vm1 = vcmask 261120  }
  0x56   : > { %568 = vsyncadd (%p832_p11), [#allocation6], 4294967040  ;;  %388 = vmatprep.subr.bf16.mxu0 %v593_v0  ;;  %392 = vmatprep.mubr.msk.bf16.mxu0 %vm594_vm0, %v593_v0  ;;  %v203_v4 = vpack.c.bf16 %v202_v3, %v202_v3  ;;  %v377_v5 = vld [vmem:[%s817_s2] ss:$0 sm:$0xff]  ;;  %s382_s4 = sshll.u32 %s637_s16, 7  ;;  %s200_s25 = scalar_lea.vmem [#allocation7], %s374_s22 }
  0x57   : > { %389 = vmatpush3.bf16.msra.mxu0 %v457_v1  ;;  %s287_s26 = sshll.u32 %s200_s25, 4  ;;  %s771_s9 = scalar_lea.hbm %s818_s3, %s382_s4  ;;  %s773_s26 = int_to_ptr.vmem [resolvable:$true] %s287_s26 }
  0x58   : > { %390 = vmatprep.subr.bf16.mxu0 %v593_v0  ;;  %s274_s10 = scalar_lea.sflag [#allocation4], %s752_s30  ;;  %s517_s16 = scalar_lea.vmem %s773_s26, 128 }
  0x59   : > { %p518_p4 = scmp.ne.s32.totalorder %s773_s26, %s517_s16  ;;  %s595_s11 = smov [#allocation7]  }
  0x5a   : > { %s521_s27 = sshll.u32 %s595_s11, 4  ;;  %s522_s27 = int_to_ptr.vmem [resolvable:$false] %s521_s27 }
  0x5b   : > { %391 = vmatpush3.bf16.msra.mxu0 %v458_v2  ;;  %p519_p6 = pnand %p518_p4, %p707_p12  ;;  %s523_s28 = scalar_lea.vmem %s522_s27, 256 }
  0x5c   : > { %p524_p10 = scmp.lt.s32.totalorder %s773_s26, %s522_s27  ;;  %p525_p13 = scmp.lt.s32.totalorder %s523_s28, %s517_s16 }
  0x5d   : > { %p520_p8 = pneg %p519_p6 }
  0x5e   : > { %393 = vmatmul.mubr.msk.bf16.vlgmr.msra.gmra.mrb[0].mxu0 %vm227_vm1, %v203_v4  ;;  %p526_p3 = por %p525_p13, %p524_p10 }
  0x60   : > { %p527_p7 = pnand %p526_p3, %p520_p8 }
 0x131   : > { %v265_v6 = vpop.f32.mrb[0].mxu0 }
 0x132   : > { %v266_v7 = vadd.f32 %v377_v5, %v265_v6  ;;  %v394_v8 = vpop.f32.mrb[1].mxu0 }
 0x133   : > { %v268_v9 = vpop.f32.mrb[2].mxu0 }
 0x134   : > { %v271_v10 = vadd.f32 %v266_v7, %v202_v3  ;;  %v395_v11 = vpop.f32.mrb[3].mxu0 }
 0x136   : > { %272 = vst.msk [vmem:[%s200_s25] sm:$0xff] %vm227_vm1, %v271_v10 }
 0x137   : > { %530 = shalt.err (!%p527_p7)
}
 0x138   : > { %s531_s29 = scalar_lea.hbm %s771_s9, 128  ;;  %s535_s22 = scalar_lea.hbm %s818_s3, 256 }
 0x139   : > { %p532_p9 = scmp.ne.s32.totalorder %s771_s9, %s531_s29  ;;  %p536_p0 = scmp.lt.u32.totalorder %s771_s9, %s818_s3 }
 0x13a   : > { %p537_p1 = scmp.lt.u32.totalorder %s535_s22, %s531_s29  ;;  %p539_p4 = scmp.lt.u32.totalorder %s531_s29, %s771_s9 }
 0x13b   : > { %p533_p2 = pnand %p532_p9, %p707_p12 }
 0x13c   : > { %p538_p11 = por %p537_p1, %p536_p0 }
 0x13d   : > { %p534_p5 = pneg %p533_p2 }
 0x13e   : > { %p540_p6 = por %p539_p4, %p538_p11 }
 0x140   : > { %p541_p8 = pnand %p540_p6, %p534_p5 }
 0x142   : > { %544 = shalt.err (!%p541_p8)
}
 0x143   : > { %402 = dma.vmem_to_hbm [thread:$0]  (%p707_p12), %s773_s26, 128, %s771_s9, %s274_s10  }
 0x144 PF: > { %s299_s18 = sand.u32 1, %s575_s12   ;;  %p833_p10 = scmp.ne.s32.totalorder %s823_s19, 0 }
 0x145   : > { %p834_p13 = scmp.ge.s32.totalorder %s587_s15, 2  ;;  %s300_s20 = scalar_lea.sflag [#allocation4], %s299_s18 }
 0x147   : > { %p413_p3 = pnand %p834_p13, %p833_p10 }
 0x149   : > { %570 = dma.done.wait (!%p413_p3), %s300_s20, 128  }
 0x14a   : > { %572 = vsyncadd (!%p413_p3), %s300_s20, 4294967168  ;;  %p17_p7 = scmp.ge.s32.totalorder %s672_s24, 4   ;;  %s835_s12 = smov %s579_s13 }
 0x14b   : > { %s836_s13 = smov %s583_s14  ;;  %s837_s14 = smov %s703_s17 }
 0x14c   : > { %s838_s15 = smov %s672_s24  ;;  %19 = sbr.rel (!%p17_p7) target bundleno = 6 (0x6), region = 81 }
 0x153   :  { %305 = vsyncpa [#allocation3], 1 }
 0x154   :  { %307 = vsyncpa [#allocation3 + $0x1], 1 }
 0x155   :  { %308 = vsyncpa [#allocation6], 1 }
 0x156   :  { %309 = vsyncpa [#allocation4], 1 }
 0x157   :  { %311 = vsyncpa [#allocation4 + $0x1], 1 }

// kernel: tpu_custom_call.1
= control target key start
LH: loop header
LB: loop body
LE: loop exit
PB: predicated region body
PF: predicated region fallthrough
CT: control target
= control target key end

     0   :  { %8 = vsyncpa [#allocation3], 0  ;;  %s815_s0 = inlined_call_operand.hbm [shape: f32[16,32], index: 0, kind: input, shape index: {}]   ;;  %s816_s1 = inlined_call_operand.hbm [shape: bf16[32,32], index: 1, kind: input, shape index: {}]   ;;  %s817_s2 = inlined_call_operand.vmem [shape: f32[1,32], index: 2, kind: input, shape index: {}]   ;;  %s818_s3 = inlined_call_operand.hbm [shape: f32[16,32], index: 3, kind: output, shape index: {}]  }
   0x1   :  { %10 = vsyncpa [#allocation3 + $0x1], 0 }
   0x2   :  { %11 = vsyncpa [#allocation6], 0 }
   0x3   :  { %12 = vsyncpa [#allocation4], 0 }
   0x4   :  { %14 = vsyncpa [#allocation4 + $0x1], 0  ;;  %s616_s12 = smov 0   ;;  %s618_s13 = smov 0  }
   0x5   :  { %s620_s14 = smov 0   ;;  %s622_s15 = smov 0  }
   0x6 LB: > { %s637_s16 = sadd.s32 4294967295, %s587_s15   ;;  %s367_s17 = sadd.s32 4294967294, %s587_s15   ;;  %s587_s15 = sphi %s622_s15, %s838_s15   ;;  %s583_s14 = sphi %s620_s14, %s837_s14   ;;  %s579_s13 = sphi %s618_s13, %s836_s13   ;;  %s575_s12 = sphi %s616_s12, %s835_s12  }
   0x7   : > { %p40_p0 = scmp.ne.s32.totalorder %s579_s13, %s575_s12  ;;  %p819_p1 = scmp.eq.s32.totalorder %s637_s16, 0 }
   0x8   : > { %p112_p3 = scmp.eq.s32.totalorder %s367_s17, 1  ;;  %p368_p5 = scmp.ge.s32.totalorder %s587_s15, 1 }
   0x9   : > { %p646_p4 = por %p819_p1, %p40_p0  ;;  %p119_p7 = scmp.lt.s32.totalorder %s587_s15, 3 }
   0xa   : > { %p651_p6 = por %p112_p3, %p40_p0  ;;  %s589_s21 = smov [#allocation5]  }
   0xb   : > { %s822_s18 = scalar_select %p646_p4, 1, 0 }
   0xc   : > { %s823_s19 = scalar_select %p651_p6, 1, 0 }
   0xd   : > { %p656_p8 = pnand %p368_p5, %p119_p7  ;;  %s131_s22 = sshll.u32 %s589_s21, 4  ;;  %s660_s22 = int_to_ptr.vmem [resolvable:$true] %s131_s22 }
   0xe   : > { %s672_s24 = sadd.s32 1, %s587_s15   ;;  %s27_s25 = sadd.s32 1, %s583_s14 }
   0xf   : > { %s824_s20 = scalar_select %p656_p8, 1, 0 }
  0x10   : > { %p404_p9 = pneg %p656_p8  ;;  %s24_s26 = ssub.s32 %s587_s15, %s672_s24 }
  0x11   : > { %s459_s29 = scalar_lea.hbm %s816_s1, 256 }
  0x12   : > { %p667_p11 = pnand %p404_p9, %p819_p1  ;;  %p460_p12 = scmp.ne.s32.totalorder %s816_s1, %s459_s29 }
  0x13   : > { %p466_p5 = scmp.lt.u32.totalorder %s459_s29, %s816_s1 }
  0x14   : > { %p461_p13 = pneg %p667_p11 }
  0x16   : > { %p462_p0 = pnand %p461_p13, %p460_p12 }
  0x18   : > { %p463_p3 = pneg %p462_p0 }
  0x1a   : > { %p468_p7 = pnand %p466_p5, %p463_p3 }
  0x1c   : > { %471 = shalt.err (!%p468_p7)
}
  0x1d   : > { %s472_s7 = scalar_lea.vmem %s660_s22, 256  ;;  %p480_p2 = scmp.lt.s32.totalorder %s660_s22, %s660_s22 }
  0x1e   : > { %p473_p9 = scmp.ne.s32.totalorder %s660_s22, %s472_s7  ;;  %p481_p6 = scmp.lt.s32.totalorder %s472_s7, %s472_s7 }
  0x20   : > { %p475_p10 = pnand %p473_p9, %p461_p13  ;;  %p482_p4 = por %p481_p6, %p480_p2 }
  0x22   : > { %p476_p1 = pneg %p475_p10 }
  0x24   : > { %p483_p8 = pnand %p482_p4, %p476_p1 }
  0x26   : > { %486 = shalt.err (!%p483_p8)
}
  0x27   : > { %s590_s8 = smov 64   ;;  %s591_s9 = smov 4  }
  0x28   : > { %407 = dma.hbm_to_vmem [thread:$0]  (!%p667_p11), %s816_s1, 256, %s660_s22, [#allocation6], %s590_s8, %s590_s8, %s591_s9  }
  0x29   : > { %p25_p2 = scmp.eq.s32.totalorder %s24_s26, 0  ;;  %p34_p1 = scmp.ne.s32.totalorder %s583_s14, %s579_s13 }
  0x2a   : > { %p35_p4 = scmp.eq.s32.totalorder %s587_s15, 0  ;;  %p417_p6 = scmp.lt.s32.totalorder %s587_s15, 2 }
  0x2b   : > { %s703_s17 = scalar_select %p25_p2, %s583_s14, %s27_s25  }
  0x2c   : > { %p36_p8 = por %p35_p4, %p34_p1  ;;  %p826_p10 = scmp.eq.s32.totalorder %s637_s16, 1 }
  0x2d   : > { %s148_s27 = sand.u32 1, %s583_s14   ;;  %s372_s28 = sshll.u32 %s587_s15, 7 }
  0x2e   : > { %p707_p12 = por %p826_p10, %p34_p1  ;;  %s371_s29 = sshll.u32 %s148_s27, 3 }
  0x2f   : > { %s716_s4 = scalar_lea.hbm %s815_s0, %s372_s28  ;;  %s152_s22 = scalar_lea.vmem [#allocation2], %s371_s29 }
  0x30   : > { %s159_s25 = sshll.u32 %s152_s22, 4  ;;  %p718_p11 = pnand %p417_p6, %p36_p8  ;;  %s722_s25 = int_to_ptr.vmem [resolvable:$true] %s159_s25 }
  0x31   : > { %s149_s5 = scalar_lea.sflag [#allocation3], %s148_s27  ;;  %s487_s6 = scalar_lea.hbm %s716_s4, 128 }
  0x32   : > { %p488_p13 = scmp.ne.s32.totalorder %s716_s4, %s487_s6  ;;  %p489_p0 = pneg %p718_p11 }
  0x33   : > { %s492_s9 = scalar_lea.hbm %s815_s0, 256  ;;  %p493_p7 = scmp.lt.u32.totalorder %s716_s4, %s815_s0 }
  0x34   : > { %p490_p3 = pnand %p489_p0, %p488_p13  ;;  %p494_p9 = scmp.lt.u32.totalorder %s492_s9, %s487_s6 }
  0x35   : > { %p496_p1 = scmp.lt.u32.totalorder %s487_s6, %s716_s4 }
  0x36   : > { %p491_p5 = pneg %p490_p3  ;;  %p495_p2 = por %p494_p9, %p493_p7 }
  0x38   : > { %p497_p4 = por %p496_p1, %p495_p2 }
  0x3a   : > { %p498_p6 = pnand %p497_p4, %p491_p5 }
  0x3c   : > { %501 = shalt.err (!%p498_p6)
}
  0x3d   : > { %s502_s27 = scalar_lea.vmem %s722_s25, 128  ;;  %s592_s28 = smov [#allocation2]  }
  0x3e   : > { %p503_p8 = scmp.ne.s32.totalorder %s722_s25, %s502_s27  ;;  %s507_s29 = sshll.u32 %s592_s28, 4  ;;  %s508_s29 = int_to_ptr.vmem [resolvable:$false] %s507_s29 }
  0x3f   : > { %s509_s23 = scalar_lea.vmem %s508_s29, 256  ;;  %p510_p3 = scmp.lt.s32.totalorder %s722_s25, %s508_s29 }
  0x40   : > { %p505_p10 = pnand %p503_p8, %p489_p0  ;;  %p511_p7 = scmp.lt.s32.totalorder %s509_s23, %s502_s27 }
  0x42   : > { %p506_p13 = pneg %p505_p10  ;;  %p512_p9 = por %p511_p7, %p510_p3 }
  0x44   : > { %p513_p2 = pnand %p512_p9, %p506_p13 }
  0x46   : > { %516 = shalt.err (!%p513_p2)
}
  0x47   : > { %411 = dma.hbm_to_vmem [thread:$0]  (!%p718_p11), %s716_s4, 128, %s722_s25, %s149_s5  }
  0x48   : > { %p829_p5 = scmp.ne.s32.totalorder %s824_s20, 0 }
  0x49   : > { %s752_s30 = sand.u32 (!%p829_p5), 1, %s579_s13   ;;  %p830_p0 = scmp.ne.s32.totalorder (!%p829_p5), %s822_s18, 0 }
  0x4a   : > { %168 = sbr.rel (%p829_p5) target bundleno = 324 (0x144), region = 32  ;;  %s374_s22 = sshll.u32 (!%p829_p5), %s752_s30, 3 }
  0x4b   : > { %s171_s6 = scalar_lea.sflag (!%p829_p5), [#allocation3], %s752_s30  ;;  %s174_s7 = scalar_lea.vmem (!%p829_p5), [#allocation2], %s374_s22 }
  0x51   : > { %562 = dma.done.wait (%p830_p0), %s171_s6, 128  }
  0x52   : > { %564 = vsyncadd (%p830_p0), %s171_s6, 4294967168  ;;  %p831_p1 = scmp.eq.s32.totalorder %s637_s16, 0 }
  0x54   : > { %566 = dma.done.wait (%p831_p1), [#allocation6], 256   ;;  %p832_p11 = pmov %p831_p1 }
  0x55   : > { %v593_v0 = vmov 0.0   ;;  %vm594_vm0 = vmmov 0   ;;  %v457_v1 = vld [vmem:[#allocation5] sm:$0xff]   ;;  %v458_v2 = vld [vmem:[#allocation5 + $0x8] sm:$0xff]   ;;  %v202_v3 = vld [vmem:[%s174_s7] sm:$0xff]  ;;  %vm227_vm1 = vcmask 261120  }
  0x56   : > { %568 = vsyncadd (%p832_p11), [#allocation6], 4294967040  ;;  %388 = vmatprep.subr.bf16.mxu0 %v593_v0  ;;  %392 = vmatprep.mubr.msk.bf16.mxu0 %vm594_vm0, %v593_v0  ;;  %v203_v4 = vpack.c.bf16 %v202_v3, %v202_v3  ;;  %v377_v5 = vld [vmem:[%s817_s2] ss:$0 sm:$0xff]  ;;  %s382_s4 = sshll.u32 %s637_s16, 7  ;;  %s200_s25 = scalar_lea.vmem [#allocation7], %s374_s22 }
  0x57   : > { %389 = vmatpush3.bf16.msra.mxu0 %v457_v1  ;;  %s287_s26 = sshll.u32 %s200_s25, 4  ;;  %s771_s9 = scalar_lea.hbm %s818_s3, %s382_s4  ;;  %s773_s26 = int_to_ptr.vmem [resolvable:$true] %s287_s26 }
  0x58   : > { %390 = vmatprep.subr.bf16.mxu0 %v593_v0  ;;  %s274_s10 = scalar_lea.sflag [#allocation4], %s752_s30  ;;  %s517_s16 = scalar_lea.vmem %s773_s26, 128 }
  0x59   : > { %p518_p4 = scmp.ne.s32.totalorder %s773_s26, %s517_s16  ;;  %s595_s11 = smov [#allocation7]  }
  0x5a   : > { %s521_s27 = sshll.u32 %s595_s11, 4  ;;  %s522_s27 = int_to_ptr.vmem [resolvable:$false] %s521_s27 }
  0x5b   : > { %391 = vmatpush3.bf16.msra.mxu0 %v458_v2  ;;  %p519_p6 = pnand %p518_p4, %p707_p12  ;;  %s523_s28 = scalar_lea.vmem %s522_s27, 256 }
  0x5c   : > { %p524_p10 = scmp.lt.s32.totalorder %s773_s26, %s522_s27  ;;  %p525_p13 = scmp.lt.s32.totalorder %s523_s28, %s517_s16 }
  0x5d   : > { %p520_p8 = pneg %p519_p6 }
  0x5e   : > { %393 = vmatmul.mubr.msk.bf16.vlgmr.msra.gmra.mrb[0].mxu0 %vm227_vm1, %v203_v4  ;;  %p526_p3 = por %p525_p13, %p524_p10 }
  0x60   : > { %p527_p7 = pnand %p526_p3, %p520_p8 }
 0x131   : > { %v265_v6 = vpop.f32.mrb[0].mxu0 }
 0x132   : > { %v266_v7 = vadd.f32 %v377_v5, %v265_v6  ;;  %v394_v8 = vpop.f32.mrb[1].mxu0 }
 0x133   : > { %v268_v9 = vpop.f32.mrb[2].mxu0 }
 0x134   : > { %v271_v10 = vadd.f32 %v266_v7, %v202_v3  ;;  %v395_v11 = vpop.f32.mrb[3].mxu0 }
 0x136   : > { %272 = vst.msk [vmem:[%s200_s25] sm:$0xff] %vm227_vm1, %v271_v10 }
 0x137   : > { %530 = shalt.err (!%p527_p7)
}
 0x138   : > { %s531_s29 = scalar_lea.hbm %s771_s9, 128  ;;  %s535_s22 = scalar_lea.hbm %s818_s3, 256 }
 0x139   : > { %p532_p9 = scmp.ne.s32.totalorder %s771_s9, %s531_s29  ;;  %p536_p0 = scmp.lt.u32.totalorder %s771_s9, %s818_s3 }
 0x13a   : > { %p537_p1 = scmp.lt.u32.totalorder %s535_s22, %s531_s29  ;;  %p539_p4 = scmp.lt.u32.totalorder %s531_s29, %s771_s9 }
 0x13b   : > { %p533_p2 = pnand %p532_p9, %p707_p12 }
 0x13c   : > { %p538_p11 = por %p537_p1, %p536_p0 }
 0x13d   : > { %p534_p5 = pneg %p533_p2 }
 0x13e   : > { %p540_p6 = por %p539_p4, %p538_p11 }
 0x140   : > { %p541_p8 = pnand %p540_p6, %p534_p5 }
 0x142   : > { %544 = shalt.err (!%p541_p8)
}
 0x143   : > { %402 = dma.vmem_to_hbm [thread:$0]  (%p707_p12), %s773_s26, 128, %s771_s9, %s274_s10  }
 0x144 PF: > { %s299_s18 = sand.u32 1, %s575_s12   ;;  %p833_p10 = scmp.ne.s32.totalorder %s823_s19, 0 }
 0x145   : > { %p834_p13 = scmp.ge.s32.totalorder %s587_s15, 2  ;;  %s300_s20 = scalar_lea.sflag [#allocation4], %s299_s18 }
 0x147   : > { %p413_p3 = pnand %p834_p13, %p833_p10 }
 0x149   : > { %570 = dma.done.wait (!%p413_p3), %s300_s20, 128  }
 0x14a   : > { %572 = vsyncadd (!%p413_p3), %s300_s20, 4294967168  ;;  %p17_p7 = scmp.ge.s32.totalorder %s672_s24, 4   ;;  %s835_s12 = smov %s579_s13 }
 0x14b   : > { %s836_s13 = smov %s583_s14  ;;  %s837_s14 = smov %s703_s17 }
 0x14c   : > { %s838_s15 = smov %s672_s24  ;;  %19 = sbr.rel (!%p17_p7) target bundleno = 6 (0x6), region = 81 }
 0x153   :  { %305 = vsyncpa [#allocation3], 1 }
 0x154   :  { %307 = vsyncpa [#allocation3 + $0x1], 1 }
 0x155   :  { %308 = vsyncpa [#allocation6], 1 }
 0x156   :  { %309 = vsyncpa [#allocation4], 1 }
 0x157   :  { %311 = vsyncpa [#allocation4 + $0x1], 1 }

</bundles_post_ra>
